<compile_context>
chip_gen: v7x
topology: tpu7x:2x2x1
jax: 0.10.0
libtpu: 0.0.40
codegen_flags: <defaults>
</compile_context>

<pallas_src>
import jax
import jax.numpy as jnp
from jax.experimental import pallas as pl
from jax.experimental.pallas import tpu as pltpu


def _round_up(x: int, m: int) -> int:
    return ((x + m - 1) // m) * m


def _aesthetic_kernel(x_ref, w_ref, b_ref, o_ref):
    # x_ref: (TB, D) VMEM tile (pipelined over the batch grid axis).
    # w_ref: (D, 1)  VMEM tile, same block every step -> stays resident.
    # b_ref: (1,)    SMEM scalar.
    # o_ref: (TB, 1) VMEM tile (tiny: output traffic is 1/D of input traffic).
    y = jnp.dot(x_ref[...], w_ref[...],
                preferred_element_type=jnp.float32)      # (TB, 1), f32 accumulate
    o_ref[...] = (y + b_ref[0]).astype(o_ref.dtype)


def aesthetic_regressor_forward(x, weight, bias, *,
                                block_b=4096,
                                vmem_limit_bytes=40 << 20):
    """Pallas forward pass of AestheticRegressor.

    Args:
      x:       (B, D) float32 (or bfloat16) embeddings.
      weight:  (1, D) float32 — torch nn.Linear(D, 1).weight layout.
      bias:    (1,)   float32 — nn.Linear(D, 1).bias.
      block_b: max batch tile size (multiple of 8).  Default 4096 -> 8 MiB x
               tile, 16 MiB double-buffered; good on v5e/v6e/v7x with the
               explicit vmem_limit_bytes below.
      vmem_limit_bytes: scoped-VMEM limit passed to Mosaic.

    Returns:
      (B,) float32 aesthetic scores.
    """
    B, D = x.shape
    w_col = weight.reshape(D, 1)            # resident (D, 1) column, natural MXU RHS

    if B < 16:
        # Single block; block_shape equal to the full array dims is legal for
        # any B (no (8,128) divisibility requirement).
        tb = B
    else:
        # At least 2 blocks so v7x's two TensorCores both get grid steps,
        # capped at block_b.  tb is a multiple of 8.
        tb = min(block_b, _round_up(pl.cdiv(B, 2), 8))

    num_tiles = pl.cdiv(B, tb)
    b_out = num_tiles * tb                  # only the OUTPUT is rounded up (~4*tb bytes)

    out = pl.pallas_call(
        _aesthetic_kernel,
        out_shape=jax.ShapeDtypeStruct((b_out, 1), jnp.float32),
        grid=(num_tiles,),
        in_specs=[
            pl.BlockSpec((tb, D), lambda i: (i, 0)),              # x tiles (last may be partial)
            pl.BlockSpec((D, 1), lambda i: (0, 0)),               # weight, resident
            pl.BlockSpec(memory_space=pltpu.MemorySpace.SMEM),    # bias scalar
        ],
        out_specs=pl.BlockSpec((tb, 1), lambda i: (i, 0)),
        compiler_params=pltpu.CompilerParams(
            dimension_semantics=("parallel",),
            vmem_limit_bytes=vmem_limit_bytes,
        ),
        cost_estimate=pl.CostEstimate(
            flops=2 * B * D,
            transcendentals=0,
            bytes_accessed=(B * D + D + 1 + B) * 4,
        ),
    )(x, w_col, bias)

    # Rows >= B in the last tile were computed from the unspecified tail of the
    # partial x block; they are discarded here.  (Safe only because the
    # contraction is over D — do not reuse this pattern for reductions over B.)
    return out[:B, 0]                                             # squeeze -> (B,)


if __name__ == "__main__":
    # ViT-B/32 -> embedding_dim = 512, matching the real module.
    D = 512
    key = jax.random.PRNGKey(0)
    kx1, kx2, kx3, kw, kb = jax.random.split(key, 5)

    # Deterministic synthetic parameters (shapes from nn.Linear(D, 1)).
    weight = jax.random.normal(kw, (1, D), dtype=jnp.float32) * 0.02
    bias = jax.random.normal(kb, (1,), dtype=jnp.float32) * 0.02

    def ref(x):
        return (x @ weight.T + bias)[:, 0]

    # Case 1: tiny batch, single-block path (B < 16, block == full dims).
    B1 = 8
    x1 = jax.random.normal(kx1, (B1, D), dtype=jnp.float32)
    y1 = jax.block_until_ready(aesthetic_regressor_forward(x1, weight, bias))
    assert y1.shape == (B1,)
    assert jnp.allclose(y1, ref(x1), atol=1e-5, rtol=1e-5)

    # Case 2: default tiling, 2 tiles with a partial last x block (no padding).
    B2 = 20
    x2 = jax.random.normal(kx2, (B2, D), dtype=jnp.float32)
    y2 = jax.block_until_ready(aesthetic_regressor_forward(x2, weight, bias))
    assert y2.shape == (B2,)
    assert jnp.allclose(y2, ref(x2), atol=1e-5, rtol=1e-5)

    # Case 3: explicit small tile to exercise the multi-tile + partial path.
    B3 = 100
    x3 = jax.random.normal(kx3, (B3, D), dtype=jnp.float32)
    y3 = jax.block_until_ready(
        aesthetic_regressor_forward(x3, weight, bias, block_b=32))
    assert y3.shape == (B3,)
    assert jnp.allclose(y3, ref(x3), atol=1e-5, rtol=1e-5)

    print("KERNEL_OK")
</pallas_src>

<mosaic_0001>
module attributes {stable_mosaic.version = 11 : i64} {
  func.func @_aesthetic_kernel(%arg0: i32, %arg1: memref<8x512xf32, #tpu.memory_space<vmem>>, %arg2: memref<512x1xf32, #tpu.memory_space<vmem>>, %arg3: memref<1xf32, #tpu.memory_space<smem>>, %arg4: memref<8x1xf32, #tpu.memory_space<vmem>>) attributes {dimension_semantics = [#tpu.dimension_semantics<parallel>], iteration_bounds = array<i64: 1>, scalar_prefetch = 0 : i64, scratch_operands = 0 : i64, tpu.core_type = #tpu.core_type<tc>, window_params = [{transform_indices = @transform_0, window_bounds = array<i64: 8, 512>}, {pipeline_mode = #tpu.pipeline_mode<synchronous>, transform_indices = @transform_1, window_bounds = array<i64: 512, 1>}, {transform_indices = @transform_2, window_bounds = array<i64: 1>}, {transform_indices = @transform_3, window_bounds = array<i64: 8, 1>}]} {
    %c0 = arith.constant 0 : index
    %c0_0 = arith.constant 0 : index
    %0 = vector.load %arg1[%c0, %c0_0] : memref<8x512xf32, #tpu.memory_space<vmem>>, vector<8x512xf32>
    %c0_1 = arith.constant 0 : index
    %c0_2 = arith.constant 0 : index
    %1 = vector.load %arg2[%c0_1, %c0_2] : memref<512x1xf32, #tpu.memory_space<vmem>>, vector<512x1xf32>
    %cst = arith.constant dense<0.000000e+00> : vector<8x1xf32>
    %2 = tpu.matmul %0, %1, %cst {dimension_numbers = #tpu.dot_dimension_numbers<[1], [0], [0], [1], [0, 0, 1, 1], [], []>} : vector<8x512xf32>, vector<512x1xf32>, vector<8x1xf32> -> vector<8x1xf32>
    %c0_3 = arith.constant 0 : index
    %3 = memref.load %arg3[%c0_3] : memref<1xf32, #tpu.memory_space<smem>>
    %4 = vector.broadcast %3 : f32 to vector<8x1xf32>
    %5 = arith.addf %2, %4 : vector<8x1xf32>
    %c0_4 = arith.constant 0 : index
    %c0_5 = arith.constant 0 : index
    %6 = vector.load %arg4[%c0_4, %c0_5] : memref<8x1xf32, #tpu.memory_space<vmem>>, vector<8x1xf32>
    tpu.vector_store %arg4[%c0_4, %c0_5], %5 {strides = array<i32>} : memref<8x1xf32, #tpu.memory_space<vmem>>, vector<8x1xf32>,
    return
  }
  func.func @transform_0(%arg0: i32) -> (i32, i32) {
    %c0_i32 = arith.constant 0 : i32
    %c0_i32_0 = arith.constant 0 : i32
    return %arg0, %c0_i32 : i32, i32
  }
  func.func @transform_1(%arg0: i32) -> (i32, i32) {
    %c0_i32 = arith.constant 0 : i32
    %c0_i32_0 = arith.constant 0 : i32
    %c0_i32_1 = arith.constant 0 : i32
    return %c0_i32, %c0_i32_0 : i32, i32
  }
  func.func @transform_2(%arg0: i32) -> i32 {
    %c0_i32 = arith.constant 0 : i32
    %c0_i32_0 = arith.constant 0 : i32
    return %c0_i32 : i32
  }
  func.func @transform_3(%arg0: i32) -> (i32, i32) {
    %c0_i32 = arith.constant 0 : i32
    %c0_i32_0 = arith.constant 0 : i32
    return %arg0, %c0_i32 : i32, i32
  }
}

</mosaic_0001>

<bundles_post_ra>
// kernel: tpu_custom_call.1
= control target key start
LH: loop header
LB: loop body
LE: loop exit
PB: predicated region body
PF: predicated region fallthrough
CT: control target
= control target key end

     0   :  { %vm225_vm0 = vcmask 7168   ;;  %s595_s1 = inlined_call_operand.vmem [shape: f32[512,1], index: 1, kind: input, shape index: {}]   ;;  %s596_s0 = inlined_call_operand.vmem [shape: f32[8,512], index: 0, kind: input, shape index: {}]   ;;  %s597_s2 = inlined_call_operand.<no memory space> [shape: f32[1], index: 2, kind: input, shape index: {}]   ;;  %s598_s3 = inlined_call_operand.vmem [shape: f32[8,1], index: 3, kind: output, shape index: {}]  }
   0x1   :  { %v35_v0 = vld [vmem:[%s595_s1 + $0x80] sm:$0xff]  ;;  %v36_v1 = vld [vmem:[%s595_s1 + $0x88] sm:$0xff]  ;;  %v37_v11 = vld [vmem:[%s595_s1 + $0x90] sm:$0xff] }
   0x2   :  { %v19_v2 = vld [vmem:[%s595_s1] sm:$0xff]  ;;  %v301_v3 = vpack.c.bf16 %v36_v1, %v35_v0  ;;  %v20_v4 = vld [vmem:[%s595_s1 + $0x8] sm:$0xff]  ;;  %v38_v13 = vld [vmem:[%s595_s1 + $0x98] sm:$0xff] }
   0x3   :  { %v67_v5 = vld [vmem:[%s595_s1 + $0x180] sm:$0xff]  ;;  %v68_v6 = vld [vmem:[%s595_s1 + $0x188] sm:$0xff]  ;;  %v303_v7 = vpack.c.bf16 %v20_v4, %v19_v2  ;;  %v21_v14 = vld [vmem:[%s595_s1 + $0x10] sm:$0xff]  ;;  %v305_v16 = vpack.c.bf16 %v38_v13, %v37_v11 }
   0x4   :  { %v333_v8 = vpack.c.bf16 %v68_v6, %v67_v5  ;;  %v51_v9 = vld [vmem:[%s595_s1 + $0x100] sm:$0xff]  ;;  %v52_v10 = vld [vmem:[%s595_s1 + $0x108] sm:$0xff]  ;;  %302 = vmatprep.subr.bf16.mxu0 %v301_v3  ;;  %v22_v15 = vld [vmem:[%s595_s1 + $0x18] sm:$0xff] }
   0x5   :  { %v335_v12 = vpack.c.bf16 %v52_v10, %v51_v9  ;;  %304 = vmatpush3.bf16.msra.mxu0 %v303_v7  ;;  %v307_v17 = vpack.c.bf16 %v22_v15, %v21_v14  ;;  %v69_v18 = vld [vmem:[%s595_s1 + $0x190] sm:$0xff]  ;;  %v70_v19 = vld [vmem:[%s595_s1 + $0x198] sm:$0xff]  ;;  %v39_v23 = vld [vmem:[%s595_s1 + $0xa0] sm:$0xff] }
   0x6   :  { %334 = vmatprep.subr.bf16.mxu1 %v333_v8  ;;  %v53_v20 = vld [vmem:[%s595_s1 + $0x110] sm:$0xff]  ;;  %v337_v21 = vpack.c.bf16 %v70_v19, %v69_v18  ;;  %v54_v22 = vld [vmem:[%s595_s1 + $0x118] sm:$0xff]  ;;  %v40_v24 = vld [vmem:[%s595_s1 + $0xa8] sm:$0xff]  ;;  %306 = vmatprep.subr.bf16.mxu0 %v305_v16 }
   0x7   :  { %336 = vmatpush3.bf16.msra.mxu1 %v335_v12  ;;  %v339_v25 = vpack.c.bf16 %v54_v22, %v53_v20  ;;  %v309_v26 = vpack.c.bf16 %v40_v24, %v39_v23  ;;  %v23_v27 = vld [vmem:[%s595_s1 + $0x20] sm:$0xff]  ;;  %v24_v28 = vld [vmem:[%s595_s1 + $0x28] sm:$0xff]  ;;  %v41_v35 = vld [vmem:[%s595_s1 + $0xb0] sm:$0xff] }
   0x8   :  { %v71_v29 = vld [vmem:[%s595_s1 + $0x1a0] sm:$0xff]  ;;  %338 = vmatprep.subr.bf16.mxu1 %v337_v21  ;;  %v72_v30 = vld [vmem:[%s595_s1 + $0x1a8] sm:$0xff]  ;;  %v311_v33 = vpack.c.bf16 %v24_v28, %v23_v27  ;;  %v42_v36 = vld [vmem:[%s595_s1 + $0xb8] sm:$0xff] }
   0x9   :  { %v55_v31 = vld [vmem:[%s595_s1 + $0x120] sm:$0xff]  ;;  %v56_v32 = vld [vmem:[%s595_s1 + $0x128] sm:$0xff]  ;;  %308 = vmatpush3.bf16.msra.mxu0 %v307_v17  ;;  %v341_v34 = vpack.c.bf16 %v72_v30, %v71_v29  ;;  %v25_v37 = vld [vmem:[%s595_s1 + $0x30] sm:$0xff]  ;;  %v313_v39 = vpack.c.bf16 %v42_v36, %v41_v35 }
   0xa   :  { %310 = vmatprep.subr.bf16.mxu0 %v309_v26  ;;  %v343_v38 = vpack.c.bf16 %v56_v32, %v55_v31  ;;  %v26_v40 = vld [vmem:[%s595_s1 + $0x38] sm:$0xff]  ;;  %v73_v41 = vld [vmem:[%s595_s1 + $0x1b0] sm:$0xff]  ;;  %v43_v46 = vld [vmem:[%s595_s1 + $0xc0] sm:$0xff] }
   0xb   :  { %340 = vmatpush3.bf16.msra.mxu1 %v339_v25  ;;  %v74_v42 = vld [vmem:[%s595_s1 + $0x1b8] sm:$0xff]  ;;  %v57_v44 = vld [vmem:[%s595_s1 + $0x130] sm:$0xff]  ;;  %v44_v47 = vld [vmem:[%s595_s1 + $0xc8] sm:$0xff]  ;;  %v315_v48 = vpack.c.bf16 %v26_v40, %v25_v37  ;;  %v84_v37 = vstv %s597_s2 }
   0xc   :  { %342 = vmatprep.subr.bf16.mxu1 %v341_v34  ;;  %v345_v43 = vpack.c.bf16 %v74_v42, %v73_v41  ;;  %v58_v45 = vld [vmem:[%s595_s1 + $0x138] sm:$0xff]  ;;  %v75_v49 = vld [vmem:[%s595_s1 + $0x1c0] sm:$0xff]  ;;  %v76_v50 = vld [vmem:[%s595_s1 + $0x1c8] sm:$0xff]  ;;  %v317_v52 = vpack.c.bf16 %v44_v47, %v43_v46 }
   0xd   :  { %312 = vmatpush3.bf16.msra.mxu0 %v311_v33  ;;  %v347_v51 = vpack.c.bf16 %v58_v45, %v57_v44  ;;  %v27_v53 = vld [vmem:[%s595_s1 + $0x40] sm:$0xff]  ;;  %v28_v54 = vld [vmem:[%s595_s1 + $0x48] sm:$0xff]  ;;  %v349_v56 = vpack.c.bf16 %v76_v50, %v75_v49  ;;  %v45_v58 = vld [vmem:[%s595_s1 + $0xd0] sm:$0xff] }
   0xe   :  { %314 = vmatprep.subr.bf16.mxu0 %v313_v39  ;;  %v59_v55 = vld [vmem:[%s595_s1 + $0x140] sm:$0xff]  ;;  %v60_v57 = vld [vmem:[%s595_s1 + $0x148] sm:$0xff]  ;;  %v46_v59 = vld [vmem:[%s595_s1 + $0xd8] sm:$0xff]  ;;  %v319_v62 = vpack.c.bf16 %v28_v54, %v27_v53 }
   0xf   :  { %344 = vmatpush3.bf16.msra.mxu1 %v343_v38  ;;  %v77_v60 = vld [vmem:[%s595_s1 + $0x1d0] sm:$0xff]  ;;  %v78_v61 = vld [vmem:[%s595_s1 + $0x1d8] sm:$0xff]  ;;  %v351_v63 = vpack.c.bf16 %v60_v57, %v59_v55  ;;  %v321_v0 = vpack.c.bf16 %v46_v59, %v45_v58  ;;  %v47_v6 = vld [vmem:[%s595_s1 + $0xe0] sm:$0xff] }
  0x10   :  { %346 = vmatprep.subr.bf16.mxu1 %v345_v43  ;;  %v29_v1 = vld [vmem:[%s595_s1 + $0x50] sm:$0xff]  ;;  %v30_v2 = vld [vmem:[%s595_s1 + $0x58] sm:$0xff]  ;;  %v353_v4 = vpack.c.bf16 %v78_v61, %v77_v60  ;;  %v48_v7 = vld [vmem:[%s595_s1 + $0xe8] sm:$0xff] }
  0x11   :  { %316 = vmatpush3.bf16.msra.mxu0 %v315_v48  ;;  %v61_v3 = vld [vmem:[%s595_s1 + $0x150] sm:$0xff]  ;;  %v62_v5 = vld [vmem:[%s595_s1 + $0x158] sm:$0xff]  ;;  %v79_v8 = vld [vmem:[%s595_s1 + $0x1e0] sm:$0xff]  ;;  %v323_v10 = vpack.c.bf16 %v30_v2, %v29_v1  ;;  %v325_v14 = vpack.c.bf16 %v48_v7, %v47_v6 }
  0x12   :  { %318 = vmatprep.subr.bf16.mxu0 %v317_v52  ;;  %v80_v9 = vld [vmem:[%s595_s1 + $0x1e8] sm:$0xff]  ;;  %v31_v11 = vld [vmem:[%s595_s1 + $0x60] sm:$0xff]  ;;  %v355_v13 = vpack.c.bf16 %v62_v5, %v61_v3  ;;  %v49_v19 = vld [vmem:[%s595_s1 + $0xf0] sm:$0xff] }
  0x13   :  { %348 = vmatpush3.bf16.msra.mxu1 %v347_v51  ;;  %v32_v12 = vld [vmem:[%s595_s1 + $0x68] sm:$0xff]  ;;  %v63_v15 = vld [vmem:[%s595_s1 + $0x160] sm:$0xff]  ;;  %v357_v18 = vpack.c.bf16 %v80_v9, %v79_v8  ;;  %v50_v20 = vld [vmem:[%s595_s1 + $0xf8] sm:$0xff] }
  0x14   :  { %350 = vmatprep.subr.bf16.mxu1 %v349_v56  ;;  %v64_v16 = vld [vmem:[%s595_s1 + $0x168] sm:$0xff]  ;;  %v18_v21 = vld [vmem:[%s596_s0 + $0x18] sm:$0xff]  ;;  %v81_v22 = vld [vmem:[%s595_s1 + $0x1f0] sm:$0xff]  ;;  %v327_v24 = vpack.c.bf16 %v32_v12, %v31_v11  ;;  %v329_v26 = vpack.c.bf16 %v50_v20, %v49_v19 }
  0x15   :  { %320 = vmatpush3.bf16.msra.mxu0 %v319_v62  ;;  %v16_v17 = vld [vmem:[%s596_s0 + $0x8] sm:$0xff]  ;;  %v82_v23 = vld [vmem:[%s595_s1 + $0x1f8] sm:$0xff]  ;;  %219 = vmatprep.mubr.f32.mxu1 %v18_v21  ;;  %v359_v25 = vpack.c.bf16 %v64_v16, %v63_v15  ;;  %v33_v27 = vld [vmem:[%s595_s1 + $0x70] sm:$0xff] }
  0x16   :  { %322 = vmatprep.subr.bf16.mxu0 %v321_v0  ;;  %149 = vmatprep.mubr.f32.mxu0 %v16_v17  ;;  %v34_v28 = vld [vmem:[%s595_s1 + $0x78] sm:$0xff]  ;;  %v361_v29 = vpack.c.bf16 %v82_v23, %v81_v22  ;;  %v65_v30 = vld [vmem:[%s595_s1 + $0x170] sm:$0xff]  ;;  %v15_v34 = vld [vmem:[%s596_s0] sm:$0xff] }
  0x17   :  { %352 = vmatpush3.bf16.msra.mxu1 %v351_v63  ;;  %v66_v31 = vld [vmem:[%s595_s1 + $0x178] sm:$0xff]  ;;  %v331_v32 = vpack.c.bf16 %v34_v28, %v33_v27  ;;  %v17_v35 = vld [vmem:[%s596_s0 + $0x10] sm:$0xff] }
  0x18   :  { %354 = vmatprep.subr.bf16.mxu1 %v353_v4  ;;  %v363_v33 = vpack.c.bf16 %v66_v31, %v65_v30 }
  0x19   :  { %324 = vmatpush3.bf16.msra.mxu0 %v323_v10 }
  0x1a   :  { %326 = vmatprep.subr.bf16.mxu0 %v325_v14 }
  0x1b   :  { %356 = vmatpush3.bf16.msra.mxu1 %v355_v13 }
  0x1c   :  { %358 = vmatprep.subr.bf16.mxu1 %v357_v18 }
  0x1d   :  { %328 = vmatpush3.bf16.msra.mxu0 %v327_v24 }
  0x1e   :  { %330 = vmatprep.subr.bf16.mxu0 %v329_v26 }
  0x1f   :  { %360 = vmatpush3.bf16.msra.mxu1 %v359_v25 }
  0x20   :  { %362 = vmatprep.subr.bf16.mxu1 %v361_v29 }
  0x21   :  { %332 = vmatpush3.bf16.msra.mxu0 %v331_v32 }
  0x23   :  { %364 = vmatpush3.bf16.msra.mxu1 %v363_v33 }
  0x24   :  { %150 = vmatmul.mubr.f32.vlgmr.msra.gmra.mrb[0].mxu0 %v15_v34 }
  0x26   :  { %220 = vmatmul.mubr.f32.vlgmr.msra.gmra.mrb[0].mxu1 %v17_v35 }
  0xf7   :  { %v263_v36 = vpop.f32.mrb[0].mxu0 }
  0xf8   :  { %v264_v38 = vpop.f32.mrb[1].mxu0 }
  0xf9   :  { %v298_v39 = vpop.f32.mrb[0].mxu1  ;;  %v265_v40 = vadd.f32 %v264_v38, %v263_v36 }
  0xfa   :  { %v299_v41 = vpop.f32.mrb[1].mxu1 }
  0xfb   :  { %v300_v42 = vadd.f32 %v299_v41, %v298_v39  ;;  %v152_v43 = vadd.f32 %v265_v40, %v84_v37 }
  0xfd   :  { %v222_v44 = vadd.f32 %v300_v42, %v152_v43 }
  0xff   :  { %226 = vst.msk [vmem:[%s598_s3] sm:$0xff] %vm225_vm0, %v222_v44 }

</bundles_post_ra>
